<compile_context>
chip_gen: v5e
topology: v5e:2x2
jax: 0.10.0
libtpu: 0.0.40
codegen_flags: <defaults>
</compile_context>

<pallas_src>
import jax
import jax.numpy as jnp
from jax.experimental import pallas as pl
from jax.experimental.pallas import tpu as pltpu


def _mlp_kernel(x_ref, w1_ref, b1_ref, w2_ref, b2_ref, wo_ref, bo_ref, o_ref):
    # Cast the x tile in VMEM to the weight dtype (no-op in the f32 path).
    x = x_ref[...].astype(w1_ref.dtype)
    # Layer 1: Linear + ReLU (f32 accumulation on the MXU).
    h = jnp.dot(x, w1_ref[...], preferred_element_type=jnp.float32)
    h = jnp.maximum(h + b1_ref[...], 0.0)
    # Layer 2: Linear + ReLU.
    h = jnp.dot(h.astype(w2_ref.dtype), w2_ref[...],
                preferred_element_type=jnp.float32)
    h = jnp.maximum(h + b2_ref[...], 0.0)
    # Output layer: Linear (no activation), written at natural num_groups width.
    out = jnp.dot(h.astype(wo_ref.dtype), wo_ref[...],
                  preferred_element_type=jnp.float32)
    o_ref[...] = (out + bo_ref[...]).astype(o_ref.dtype)


def _round_up(a, m):
    return ((a + m - 1) // m) * m


def prepare_params(params, *, use_bf16=False):
    """One-time param prep: transpose to [in, out], reshape biases, optional
    bf16 weight cast.  Do this once, outside the per-call forward path."""
    w1, b1, w2, b2, wo, bo = params
    wdt = jnp.bfloat16 if use_bf16 else jnp.float32
    w1_t = w1.T.astype(wdt)                       # [in_dim, hid]
    w2_t = w2.T.astype(wdt)                       # [hid, hid]
    wo_t = wo.T.astype(wdt)                       # [hid, n_groups]
    b1_r = b1.reshape(1, -1).astype(jnp.float32)  # [1, hid]
    b2_r = b2.reshape(1, -1).astype(jnp.float32)  # [1, hid]
    bo_r = bo.reshape(1, -1).astype(jnp.float32)  # [1, n_groups]
    return (w1_t, b1_r, w2_t, b2_r, wo_t, bo_r)


def sub_discriminator_forward(x, prepared_params, *, tile_b=2048, megacore=False):
    """Fused MLP forward. x: [B, input_dim] f32 -> [B, num_groups] f32.

    prepared_params: output of prepare_params().
    tile_b: max batch-tile rows (multiple of 8); big tiles amortize the
            ~0.35us/step overhead and keep the MXU's M dimension fat.
    megacore: set True on v7x (2 TCs) to split large batches into >=2
              "parallel" grid steps; only applied when each step keeps
              >=512 rows (otherwise the split is pure overhead).
    """
    w1_t, b1_r, w2_t, b2_r, wo_t, bo_r = prepared_params
    B, in_dim = x.shape
    hid = w1_t.shape[1]
    n_groups = wo_t.shape[1]

    tile_b = max(8, _round_up(tile_b, 8))
    if B <= tile_b:
        # Single block over the whole batch (full-dim exception of the (8,128)
        # rule makes any B valid). No forced split on single-TC v5e/v6e.
        tile = B
        if megacore and B >= 1024:
            tile = _round_up(pl.cdiv(B, 2), 8)
    else:
        tile = tile_b  # multiple of 8; partial tail block handled by Pallas.
    grid = (pl.cdiv(B, tile),)

    return pl.pallas_call(
        _mlp_kernel,
        out_shape=jax.ShapeDtypeStruct((B, n_groups), x.dtype),
        grid_spec=pl.GridSpec(
            grid=grid,
            in_specs=[
                pl.BlockSpec((tile, in_dim), lambda i: (i, 0)),      # x tile
                pl.BlockSpec((in_dim, hid), lambda i: (0, 0)),       # W1^T
                pl.BlockSpec((1, hid), lambda i: (0, 0)),            # b1
                pl.BlockSpec((hid, hid), lambda i: (0, 0)),          # W2^T
                pl.BlockSpec((1, hid), lambda i: (0, 0)),            # b2
                pl.BlockSpec((hid, n_groups), lambda i: (0, 0)),     # Wo^T
                pl.BlockSpec((1, n_groups), lambda i: (0, 0)),       # bo
            ],
            out_specs=pl.BlockSpec((tile, n_groups), lambda i: (i, 0)),
        ),
        compiler_params=pltpu.CompilerParams(
            dimension_semantics=("parallel",),
        ),
    )(x, w1_t, b1_r, w2_t, b2_r, wo_t, bo_r)


def init_params(key, in_dim, hid, n_groups):
    """Deterministic synthetic init (PyTorch Linear shapes: W=[out,in], b=[out])."""
    ks = jax.random.split(key, 6)
    s1 = 1.0 / jnp.sqrt(in_dim)
    s2 = 1.0 / jnp.sqrt(hid)
    w1 = jax.random.uniform(ks[0], (hid, in_dim), jnp.float32, -s1, s1)
    b1 = jax.random.uniform(ks[1], (hid,), jnp.float32, -s1, s1)
    w2 = jax.random.uniform(ks[2], (hid, hid), jnp.float32, -s2, s2)
    b2 = jax.random.uniform(ks[3], (hid,), jnp.float32, -s2, s2)
    wo = jax.random.uniform(ks[4], (n_groups, hid), jnp.float32, -s2, s2)
    bo = jax.random.uniform(ks[5], (n_groups,), jnp.float32, -s2, s2)
    return (w1, b1, w2, b2, wo, bo)


def reference_forward(x, params):
    """Pure-JAX reference matching the PyTorch module's forward."""
    w1, b1, w2, b2, wo, bo = params
    h = jnp.maximum(x @ w1.T + b1, 0.0)
    h = jnp.maximum(h @ w2.T + b2, 0.0)
    return h @ wo.T + bo


if __name__ == "__main__":
    key = jax.random.PRNGKey(0)
    k_x1, k_x2, k_x3, k_p = jax.random.split(key, 4)

    emb_size, hidden, num_groups = 32, 32, 4
    params = init_params(k_p, emb_size, hidden, num_groups)
    prepped = prepare_params(params)   # one-time: transposes / reshapes

    # GradientReversal is identity in forward; dropout p=0 and BN disabled.
    # Case 1: tiny batch, single full-batch block.
    B1 = 8
    x1 = jax.random.normal(k_x1, (B1, emb_size), jnp.float32)
    out1 = jax.block_until_ready(sub_discriminator_forward(x1, prepped))
    ref1 = reference_forward(x1, params)
    assert out1.shape == (B1, num_groups)
    assert jnp.allclose(out1, ref1, atol=1e-5, rtol=1e-5), "mismatch vs reference (B=8)"

    # Case 2: batch not a multiple of 8, single full-dim block (no padding op).
    B2 = 20
    x2 = jax.random.normal(k_x2, (B2, emb_size), jnp.float32)
    out2 = jax.block_until_ready(sub_discriminator_forward(x2, prepped))
    ref2 = reference_forward(x2, params)
    assert out2.shape == (B2, num_groups)
    assert jnp.allclose(out2, ref2, atol=1e-5, rtol=1e-5), "mismatch vs reference (B=20)"

    # Case 3: multi-step grid with a partial tail block (boundary masking path).
    B3 = 300
    x3 = jax.random.normal(k_x3, (B3, emb_size), jnp.float32)
    out3 = jax.block_until_ready(sub_discriminator_forward(x3, prepped, tile_b=128))
    ref3 = reference_forward(x3, params)
    assert out3.shape == (B3, num_groups)
    assert jnp.allclose(out3, ref3, atol=1e-5, rtol=1e-5), "mismatch vs reference (B=300)"

    # TODO(synk): adv_gated (Inputs one-hot concat / Augmentation_layer) and
    # BatchNorm/Dropout variants are disabled in this config and not implemented.
    print("KERNEL_OK")
</pallas_src>

<mosaic_0001>
module attributes {stable_mosaic.version = 11 : i64} {
  func.func @_mlp_kernel(%arg0: i32, %arg1: memref<8x32xf32, #tpu.memory_space<vmem>>, %arg2: memref<32x32xf32, #tpu.memory_space<vmem>>, %arg3: memref<1x32xf32, #tpu.memory_space<vmem>>, %arg4: memref<32x32xf32, #tpu.memory_space<vmem>>, %arg5: memref<1x32xf32, #tpu.memory_space<vmem>>, %arg6: memref<32x4xf32, #tpu.memory_space<vmem>>, %arg7: memref<1x4xf32, #tpu.memory_space<vmem>>, %arg8: memref<8x4xf32, #tpu.memory_space<vmem>>) attributes {dimension_semantics = [#tpu.dimension_semantics<parallel>], iteration_bounds = array<i64: 1>, scalar_prefetch = 0 : i64, scratch_operands = 0 : i64, tpu.core_type = #tpu.core_type<tc>, window_params = [{transform_indices = @transform_0, window_bounds = array<i64: 8, 32>}, {pipeline_mode = #tpu.pipeline_mode<synchronous>, transform_indices = @transform_1, window_bounds = array<i64: 32, 32>}, {pipeline_mode = #tpu.pipeline_mode<synchronous>, transform_indices = @transform_2, window_bounds = array<i64: 1, 32>}, {pipeline_mode = #tpu.pipeline_mode<synchronous>, transform_indices = @transform_3, window_bounds = array<i64: 32, 32>}, {pipeline_mode = #tpu.pipeline_mode<synchronous>, transform_indices = @transform_4, window_bounds = array<i64: 1, 32>}, {pipeline_mode = #tpu.pipeline_mode<synchronous>, transform_indices = @transform_5, window_bounds = array<i64: 32, 4>}, {pipeline_mode = #tpu.pipeline_mode<synchronous>, transform_indices = @transform_6, window_bounds = array<i64: 1, 4>}, {transform_indices = @transform_7, window_bounds = array<i64: 8, 4>}]} {
    %c0 = arith.constant 0 : index
    %c0_0 = arith.constant 0 : index
    %0 = vector.load %arg1[%c0, %c0_0] : memref<8x32xf32, #tpu.memory_space<vmem>>, vector<8x32xf32>
    %c0_1 = arith.constant 0 : index
    %c0_2 = arith.constant 0 : index
    %1 = vector.load %arg2[%c0_1, %c0_2] : memref<32x32xf32, #tpu.memory_space<vmem>>, vector<32x32xf32>
    %cst = arith.constant dense<0.000000e+00> : vector<8x32xf32>
    %2 = tpu.matmul %0, %1, %cst {dimension_numbers = #tpu.dot_dimension_numbers<[1], [0], [0], [1], [0, 0, 1, 1], [], []>} : vector<8x32xf32>, vector<32x32xf32>, vector<8x32xf32> -> vector<8x32xf32>
    %c0_3 = arith.constant 0 : index
    %c0_4 = arith.constant 0 : index
    %3 = vector.load %arg3[%c0_3, %c0_4] : memref<1x32xf32, #tpu.memory_space<vmem>>, vector<1x32xf32>
    %4 = vector.broadcast %3 : vector<1x32xf32> to vector<8x32xf32>
    %5 = arith.addf %2, %4 : vector<8x32xf32>
    %cst_5 = arith.constant 0.000000e+00 : f32
    %6 = vector.broadcast %cst_5 : f32 to vector<8x32xf32>
    %7 = arith.maximumf %5, %6 : vector<8x32xf32>
    %c0_6 = arith.constant 0 : index
    %c0_7 = arith.constant 0 : index
    %8 = vector.load %arg4[%c0_6, %c0_7] : memref<32x32xf32, #tpu.memory_space<vmem>>, vector<32x32xf32>
    %cst_8 = arith.constant dense<0.000000e+00> : vector<8x32xf32>
    %9 = tpu.matmul %7, %8, %cst_8 {dimension_numbers = #tpu.dot_dimension_numbers<[1], [0], [0], [1], [0, 0, 1, 1], [], []>} : vector<8x32xf32>, vector<32x32xf32>, vector<8x32xf32> -> vector<8x32xf32>
    %c0_9 = arith.constant 0 : index
    %c0_10 = arith.constant 0 : index
    %10 = vector.load %arg5[%c0_9, %c0_10] : memref<1x32xf32, #tpu.memory_space<vmem>>, vector<1x32xf32>
    %11 = vector.broadcast %10 : vector<1x32xf32> to vector<8x32xf32>
    %12 = arith.addf %9, %11 : vector<8x32xf32>
    %cst_11 = arith.constant 0.000000e+00 : f32
    %13 = vector.broadcast %cst_11 : f32 to vector<8x32xf32>
    %14 = arith.maximumf %12, %13 : vector<8x32xf32>
    %c0_12 = arith.constant 0 : index
    %c0_13 = arith.constant 0 : index
    %15 = vector.load %arg6[%c0_12, %c0_13] : memref<32x4xf32, #tpu.memory_space<vmem>>, vector<32x4xf32>
    %cst_14 = arith.constant dense<0.000000e+00> : vector<8x4xf32>
    %16 = tpu.matmul %14, %15, %cst_14 {dimension_numbers = #tpu.dot_dimension_numbers<[1], [0], [0], [1], [0, 0, 1, 1], [], []>} : vector<8x32xf32>, vector<32x4xf32>, vector<8x4xf32> -> vector<8x4xf32>
    %c0_15 = arith.constant 0 : index
    %c0_16 = arith.constant 0 : index
    %17 = vector.load %arg7[%c0_15, %c0_16] : memref<1x4xf32, #tpu.memory_space<vmem>>, vector<1x4xf32>
    %18 = vector.broadcast %17 : vector<1x4xf32> to vector<8x4xf32>
    %19 = arith.addf %16, %18 : vector<8x4xf32>
    %c0_17 = arith.constant 0 : index
    %c0_18 = arith.constant 0 : index
    %20 = vector.load %arg8[%c0_17, %c0_18] : memref<8x4xf32, #tpu.memory_space<vmem>>, vector<8x4xf32>
    tpu.vector_store %arg8[%c0_17, %c0_18], %19 {strides = array<i32>} : memref<8x4xf32, #tpu.memory_space<vmem>>, vector<8x4xf32>,
    return
  }
  func.func @transform_0(%arg0: i32) -> (i32, i32) {
    %c0_i32 = arith.constant 0 : i32
    %c0_i32_0 = arith.constant 0 : i32
    return %arg0, %c0_i32 : i32, i32
  }
  func.func @transform_1(%arg0: i32) -> (i32, i32) {
    %c0_i32 = arith.constant 0 : i32
    %c0_i32_0 = arith.constant 0 : i32
    %c0_i32_1 = arith.constant 0 : i32
    return %c0_i32, %c0_i32_0 : i32, i32
  }
  func.func @transform_2(%arg0: i32) -> (i32, i32) {
    %c0_i32 = arith.constant 0 : i32
    %c0_i32_0 = arith.constant 0 : i32
    %c0_i32_1 = arith.constant 0 : i32
    return %c0_i32, %c0_i32_0 : i32, i32
  }
  func.func @transform_3(%arg0: i32) -> (i32, i32) {
    %c0_i32 = arith.constant 0 : i32
    %c0_i32_0 = arith.constant 0 : i32
    %c0_i32_1 = arith.constant 0 : i32
    return %c0_i32, %c0_i32_0 : i32, i32
  }
  func.func @transform_4(%arg0: i32) -> (i32, i32) {
    %c0_i32 = arith.constant 0 : i32
    %c0_i32_0 = arith.constant 0 : i32
    %c0_i32_1 = arith.constant 0 : i32
    return %c0_i32, %c0_i32_0 : i32, i32
  }
  func.func @transform_5(%arg0: i32) -> (i32, i32) {
    %c0_i32 = arith.constant 0 : i32
    %c0_i32_0 = arith.constant 0 : i32
    %c0_i32_1 = arith.constant 0 : i32
    return %c0_i32, %c0_i32_0 : i32, i32
  }
  func.func @transform_6(%arg0: i32) -> (i32, i32) {
    %c0_i32 = arith.constant 0 : i32
    %c0_i32_0 = arith.constant 0 : i32
    %c0_i32_1 = arith.constant 0 : i32
    return %c0_i32, %c0_i32_0 : i32, i32
  }
  func.func @transform_7(%arg0: i32) -> (i32, i32) {
    %c0_i32 = arith.constant 0 : i32
    %c0_i32_0 = arith.constant 0 : i32
    return %arg0, %c0_i32 : i32, i32
  }
}

</mosaic_0001>

<bundles_post_ra>
// kernel: tpu_custom_call.1
= control target key start
LH: loop header
LB: loop body
LE: loop exit
PB: predicated region body
PF: predicated region fallthrough
CT: control target
= control target key end

     0   :  { %12 = vsyncpa [#allocation3], 0  ;;  %s312_s0 = inlined_call_operand.hbm [shape: f32[8,32], index: 0, kind: input, shape index: {}]   ;;  %s313_s1 = inlined_call_operand.vmem [shape: f32[32,32], index: 1, kind: input, shape index: {}]   ;;  %s314_s2 = inlined_call_operand.vmem [shape: f32[1,32], index: 2, kind: input, shape index: {}]   ;;  %s315_s3 = inlined_call_operand.hbm [shape: f32[32,32], index: 3, kind: input, shape index: {}]   ;;  %s316_s4 = inlined_call_operand.vmem [shape: f32[1,32], index: 4, kind: input, shape index: {}]   ;;  %s317_s5 = inlined_call_operand.vmem [shape: f32[32,4], index: 5, kind: input, shape index: {}]   ;;  %s318_s6 = inlined_call_operand.vmem [shape: f32[1,4], index: 6, kind: input, shape index: {}]   ;;  %s319_s7 = inlined_call_operand.vmem [shape: f32[8,4], index: 7, kind: output, shape index: {}]  }
   0x1   :  { %s19_s26 = sshll.u32 %s312_s0, 4  ;;  %s20_s26 = int_to_ptr.hbm [resolvable:$true] %s19_s26 }
   0x2   :  { %13 = vsyncpa [#allocation5], 0  ;;  %s223_s27 = smov [#allocation2]   ;;  %s33_s8 = sshll.u32 %s315_s3, 4  ;;  %s34_s8 = int_to_ptr.hbm [resolvable:$true] %s33_s8 }
   0x3   :  { %s21_s28 = sshll.u32 %s223_s27, 4  ;;  %s224_s9 = smov [#allocation4]   ;;  %s22_s28 = int_to_ptr.vmem [resolvable:$true] %s21_s28 }
   0x4   :  { %24 = dma.hbm_to_vmem [thread:$0]  %s20_s26, 128, %s22_s28, [#allocation3]  }
   0x5   :  { %s35_s10 = sshll.u32 %s224_s9, 4  ;;  %s225_s11 = smov 128   ;;  %s36_s10 = int_to_ptr.vmem [resolvable:$true] %s35_s10 }
   0x6   :  { %s226_s12 = smov 8  }
   0x7   :  { %41 = dma.hbm_to_vmem [thread:$0]  %s34_s8, 512, %s36_s10, [#allocation5], %s225_s11, %s225_s11, %s226_s12  }
   0x8   :  { %219 = dma.done.wait [#allocation3], 128  }
   0x9   :  { %220 = vsyncadd [#allocation3], 4294967168 }
   0xa   :  { %221 = dma.done.wait [#allocation5], 512  }
   0xb   :  { %222 = vsyncadd [#allocation5], 4294966784  ;;  %v60_v0 = vld [vmem:[%s313_s1 + $0x18] sm:$0xff]  ;;  %v59_v1 = vld [vmem:[%s313_s1 + $0x10] sm:$0xff]  ;;  %vm65_vm0 = vcmask 261120   ;;  %vm153_vm1 = vcmask 31744  }
   0xc   :  { %81 = vmatpush.msra.mxu0 %v60_v0  ;;  %v93_v2 = vld [vmem:[#allocation4 + $0x18] sm:$0xff]  ;;  %v58_v3 = vld [vmem:[%s313_s1 + $0x8] sm:$0xff]  ;;  %v92_v6 = vld [vmem:[#allocation4 + $0x10] sm:$0xff] }
   0xd   :  { %113 = vmatpush.msra.mxu1 %v93_v2  ;;  %v57_v4 = vld [vmem:[%s313_s1] sm:$0xff]  ;;  %v91_v7 = vld [vmem:[#allocation4 + $0x8] sm:$0xff]  ;;  %v90_v8 = vld [vmem:[#allocation4] sm:$0xff] }
   0xe   :  { %82 = vmatpush.msra.mxu0 %v59_v1  ;;  %v56_v5 = vld [vmem:[#allocation2] sm:$0xff]  ;;  %v125_v9 = vld [vmem:[%s317_s5 + $0x18] sm:$0xff]  ;;  %v124_v14 = vld [vmem:[%s317_s5 + $0x10] sm:$0xff] }
   0xf   :  { %114 = vmatpush.msra.mxu1 %v92_v6  ;;  %145 = vmatpush.msra.mxu2 %v125_v9  ;;  %v168_v10 = vld [vmem:[%s314_s2] ss:$0 sm:$0xff]  ;;  %v123_v15 = vld [vmem:[%s317_s5 + $0x8] sm:$0xff] }
  0x10   :  { %83 = vmatpush.msra.mxu0 %v58_v3  ;;  %v122_v16 = vld [vmem:[%s317_s5] sm:$0xff] }
  0x11   :  { %115 = vmatpush.msra.mxu1 %v91_v7  ;;  %146 = vmatpush.msra.mxu2 %v124_v14  ;;  %v169_v17 = vld [vmem:[%s316_s4] ss:$0 sm:$0xff] }
  0x12   :  { %84 = vmatpush.msra.mxu0 %v57_v4  ;;  %v170_v21 = vld [vmem:[%s318_s6] ss:$0 sm:$0xff] }
  0x13   :  { %161 = vmatmul.msk.f32.vlgmr.msra.gmra.mxu0 %vm65_vm0, %v56_v5  ;;  %116 = vmatpush.msra.mxu1 %v90_v8 }
  0x14   :  { %147 = vmatpush.msra.mxu2 %v123_v15 }
  0x16   :  { %148 = vmatpush.msra.mxu2 %v122_v16 }
  0x90   :  { %v86_v11 = vpop.f32.mrf.mxu0 }
  0x91   :  { %v87_v12 = vadd.f32 %v168_v10, %v86_v11 }
  0x93   :  { %v89_v13 = vmax.f32 %v87_v12, 0.0 }
  0x95   :  { %162 = vmatmul.msk.f32.vlgmr.msra.gmra.mxu1 %vm65_vm0, %v89_v13 }
 0x112   :  { %v118_v18 = vpop.f32.mrf.mxu1 }
 0x113   :  { %v119_v19 = vadd.f32 %v169_v17, %v118_v18 }
 0x115   :  { %v121_v20 = vmax.f32 %v119_v19, 0.0 }
 0x117   :  { %163 = vmatmul.msk.f32.vlgmr.msra.gmra.mxu2 %vm65_vm0, %v121_v20 }
 0x19a   :  { %v150_v22 = vpop.f32.mrf.mxu2 }
 0x19b   :  { %v151_v23 = vadd.f32 %v170_v21, %v150_v22 }
 0x19d   :  { %154 = vst.msk [vmem:[%s319_s7] sm:$0xff] %vm153_vm1, %v151_v23 }
 0x19e   :  { %159 = vsyncpa [#allocation3], 1 }
 0x19f   :  { %160 = vsyncpa [#allocation5], 1 }

</bundles_post_ra>
